<compile_context>
chip_gen: v5e
topology: v5e:2x2
jax: 0.10.0
libtpu: 0.0.40
codegen_flags: <defaults>
</compile_context>

<pallas_src>
import functools

import jax
import jax.numpy as jnp
from jax.experimental import pallas as pl
from jax.experimental.pallas import tpu as pltpu


_HIGHEST = jax.lax.Precision.HIGHEST
_FALLBACK_VMEM_BYTES = 64 * 1024 * 1024      # conservative (v7x per-core VMEM)


def _vmem_capacity_bytes():
    """Per-core VMEM capacity (generation aware), with a safe fallback."""
    try:
        cap = int(getattr(pltpu.get_tpu_info(), "vmem_capacity_bytes", 0) or 0)
        if cap > 0:
            return min(cap, 128 * 1024 * 1024)
    except Exception:
        pass
    return _FALLBACK_VMEM_BYTES


# ---------------------------------------------------------------------------
# Kernels
# ---------------------------------------------------------------------------
def _fused_kernel_2d(x_ref, kw_ref, w1_ref, b1_ref, w2_ref, b2_ref, o_ref):
    """Single-pass SqueezeExcite for one (C, N) row (image / F == 1 layout).

    Both large contractions run on the MXU (f32 accumulation); bf16 inputs are
    fed to the MXU directly instead of upcasting the whole tile.
    """
    x = x_ref[0]                                            # (C, N), x dtype
    logits = jnp.dot(kw_ref[...], x,                        # (1, N) f32
                     preferred_element_type=jnp.float32, precision=_HIGHEST)
    m = jnp.max(logits, axis=-1, keepdims=True)
    e = jnp.exp(logits - m)                                 # (1, N) f32
    inv_l = pl.reciprocal(jnp.sum(e, axis=-1, keepdims=True), approx=False)
    attn = (e * inv_l).astype(x.dtype)                      # (1, N)
    pooled = jax.lax.dot_general(                           # (C, 1) f32
        x, attn, (((1,), (1,)), ((), ())),
        preferred_element_type=jnp.float32, precision=_HIGHEST)
    h = jnp.dot(w1_ref[...], pooled,
                preferred_element_type=jnp.float32, precision=_HIGHEST)
    h = h + b1_ref[...]
    h = jnp.where(h >= 0.0, h, 0.1 * h)                     # LeakyReLU(0.1)
    g = jnp.dot(w2_ref[...], h,
                preferred_element_type=jnp.float32, precision=_HIGHEST)
    g = g + b2_ref[...]
    gate = jax.nn.sigmoid(g).astype(x.dtype)                # (C, 1)
    o_ref[0] = (x * gate).astype(o_ref.dtype)


def _fused_kernel_frames(x_ref, kw_ref, w1_ref, b1_ref, w2_ref, b2_ref, o_ref):
    """Single-pass SqueezeExcite for one (C, F, N) row (video, F frames).

    Handles any per-frame N (no 128-lane requirement) without transposing the
    input: softmax / pooling run per frame along the last axis.
    """
    x = x_ref[0].astype(jnp.float32)                        # (C, F, N)
    kw = kw_ref[...]                                        # (C, 1) f32
    logits = jnp.sum(x * kw[:, :, None], axis=0)            # (F, N)
    m = jnp.max(logits, axis=-1, keepdims=True)             # (F, 1)
    e = jnp.exp(logits - m)                                 # (F, N)
    inv_l = pl.reciprocal(jnp.sum(e, axis=-1, keepdims=True), approx=False)
    attn = e * inv_l                                        # (F, N)
    pooled = jnp.sum(x * attn[None, :, :], axis=-1)         # (C, F)
    h = jnp.dot(w1_ref[...], pooled,
                preferred_element_type=jnp.float32, precision=_HIGHEST)
    h = h + b1_ref[...]
    h = jnp.where(h >= 0.0, h, 0.1 * h)
    g = jnp.dot(w2_ref[...], h,
                preferred_element_type=jnp.float32, precision=_HIGHEST)
    g = g + b2_ref[...]
    gates = jax.nn.sigmoid(g)                               # (C, F)
    o_ref[0] = (x * gates[:, :, None]).astype(o_ref.dtype)


def _pool_gate_kernel(x_ref, kw_ref, w1_ref, b1_ref, w2_ref, b2_ref,
                      gates_ref, m_sc, l_sc, acc_sc, *, tn, n_valid, ragged):
    """Pass 1: online-softmax attention pooling over N tiles + fused gate MLP.

    Grid = (B, F, n_tiles) with the reduction (n) axis last.  Emits the final
    sigmoid gates (B, F, C, 1) directly (the tiny MLP runs in the last-tile
    finalize), so there is no separate gate kernel and no pooled round trip.
    A ragged (N % tn != 0) tail tile is masked.
    """
    n = pl.program_id(2)

    @pl.when(n == 0)
    def _():
        m_sc[...] = jnp.full(m_sc.shape, -jnp.inf, jnp.float32)
        l_sc[...] = jnp.zeros(l_sc.shape, jnp.float32)
        acc_sc[...] = jnp.zeros(acc_sc.shape, jnp.float32)

    x = x_ref[0]                                             # (C, tn), x dtype
    if ragged:
        col = jax.lax.broadcasted_iota(jnp.int32, (1, tn), 1) + n * tn
        valid = col < n_valid
        x = jnp.where(valid, x, jnp.zeros_like(x))

    # to_k 1x1 conv; bias omitted: softmax is shift-invariant.
    logits = jnp.dot(kw_ref[...], x,                         # (1, tn) f32
                     preferred_element_type=jnp.float32, precision=_HIGHEST)
    if ragged:
        logits = jnp.where(valid, logits, -jnp.inf)

    m_prev = m_sc[...]
    m_new = jnp.maximum(m_prev, jnp.max(logits, axis=-1, keepdims=True))
    corr = jnp.exp(m_prev - m_new)
    e = jnp.exp(logits - m_new)                              # (1, tn) f32
    l_sc[...] = corr * l_sc[...] + jnp.sum(e, axis=-1, keepdims=True)
    acc_sc[...] = corr * acc_sc[...] + jax.lax.dot_general(  # (C, 1) f32
        x, e.astype(x.dtype), (((1,), (1,)), ((), ())),
        preferred_element_type=jnp.float32, precision=_HIGHEST)
    m_sc[...] = m_new

    @pl.when(n == pl.num_programs(2) - 1)
    def _():
        pooled = acc_sc[...] * pl.reciprocal(l_sc[...], approx=False)
        h = jnp.dot(w1_ref[...], pooled,
                    preferred_element_type=jnp.float32, precision=_HIGHEST)
        h = h + b1_ref[...]
        h = jnp.where(h >= 0.0, h, 0.1 * h)
        g = jnp.dot(w2_ref[...], h,
                    preferred_element_type=jnp.float32, precision=_HIGHEST)
        g = g + b2_ref[...]
        gates_ref[0, 0] = jax.nn.sigmoid(g)                  # (C, 1)


def _apply_gates_kernel(x_ref, g_ref, o_ref):
    """Pass 2: lane-dense elementwise gates * x (multiply in the I/O dtype)."""
    x = x_ref[0]                                             # (C, tn)
    o_ref[0] = (x * g_ref[0, 0].astype(x.dtype)).astype(o_ref.dtype)


# ---------------------------------------------------------------------------
# Tiling / wrappers
# ---------------------------------------------------------------------------
def _pick_spatial_tile(n_frame, c, itemsize, cap, block_bytes, need_divisor):
    """Lane tile tn (multiple of 128) for streaming (C, tn) blocks.

    Accounts for 2x in + 2x out double-buffered copies plus temporaries so the
    pass-2 working set stays well under the per-generation VMEM capacity.
    """
    if n_frame <= 128:
        return n_frame
    per_lane_block = max(1, c * itemsize)                    # one buffered copy
    per_lane_vmem = max(1, c * (5 * itemsize + 4))            # bufs + f32 temps
    tn = min(n_frame,
             block_bytes // per_lane_block,
             int(0.45 * cap) // per_lane_vmem)
    tn = max(128, (tn // 128) * 128)
    if need_divisor:                                          # n_frame % 128 == 0
        while n_frame % tn:
            tn -= 128
    return tn


def _forward(x4, params, *, force_two_pass=False, spatial_block_bytes=None):
    """SqueezeExcite forward on x of shape (B, C, F, N) with N = H*W."""
    kw, _kb, w1, b1, w2, b2 = params      # to_k bias dropped: softmax shift-inv
    B, C, F, N = x4.shape
    Hd = w1.shape[0]
    isz = x4.dtype.itemsize

    cap = _vmem_capacity_bytes()
    vmem_limit = min(int(cap * 0.9), 128 * 1024 * 1024)
    param_bytes = 8 * (2 * C + 2 * Hd * C + Hd)

    # --- fused single-pass path: one HBM read + one write of x --------------
    if F == 1:
        fused_bytes = C * N * (4 * isz + 8) + 16 * N + param_bytes
    else:
        fused_bytes = C * F * N * (4 * isz + 12) + param_bytes

    if (not force_two_pass) and fused_bytes <= int(0.6 * cap):
        if F == 1:
            x3 = x4.reshape(B, C, N)
            kw_row = kw.reshape(1, C).astype(x4.dtype)
            out = pl.pallas_call(
                _fused_kernel_2d,
                out_shape=jax.ShapeDtypeStruct((B, C, N), x4.dtype),
                grid_spec=pltpu.PrefetchScalarGridSpec(
                    num_scalar_prefetch=0,
                    grid=(B,),
                    in_specs=[
                        pl.BlockSpec((1, C, N), lambda b: (b, 0, 0)),
                        pl.BlockSpec((1, C),   lambda b: (0, 0)),
                        pl.BlockSpec((Hd, C),  lambda b: (0, 0)),
                        pl.BlockSpec((Hd, 1),  lambda b: (0, 0)),
                        pl.BlockSpec((C, Hd),  lambda b: (0, 0)),
                        pl.BlockSpec((C, 1),   lambda b: (0, 0)),
                    ],
                    out_specs=pl.BlockSpec((1, C, N), lambda b: (b, 0, 0))),
                compiler_params=pltpu.CompilerParams(
                    dimension_semantics=("parallel",),
                    vmem_limit_bytes=vmem_limit),
            )(x3, kw_row, w1, b1, w2, b2)
            return out.reshape(B, C, F, N)
        return pl.pallas_call(
            _fused_kernel_frames,
            out_shape=jax.ShapeDtypeStruct((B, C, F, N), x4.dtype),
            grid_spec=pltpu.PrefetchScalarGridSpec(
                num_scalar_prefetch=0,
                grid=(B,),
                in_specs=[
                    pl.BlockSpec((1, C, F, N), lambda b: (b, 0, 0, 0)),
                    pl.BlockSpec((C, 1),  lambda b: (0, 0)),
                    pl.BlockSpec((Hd, C), lambda b: (0, 0)),
                    pl.BlockSpec((Hd, 1), lambda b: (0, 0)),
                    pl.BlockSpec((C, Hd), lambda b: (0, 0)),
                    pl.BlockSpec((C, 1),  lambda b: (0, 0)),
                ],
                out_specs=pl.BlockSpec((1, C, F, N), lambda b: (b, 0, 0, 0))),
            compiler_params=pltpu.CompilerParams(
                dimension_semantics=("parallel",),
                vmem_limit_bytes=vmem_limit),
        )(x4, kw, w1, b1, w2, b2)

    # --- two-pass path (rows too large to keep resident in VMEM) ------------
    if F > 1 and (N % 128) != 0:
        # Rare shape: large, non-lane-aligned per-frame spatial.
        # TODO(synk): costs one transpose round trip through HBM; could be
        # removed with masked per-frame lane windows.
        xt = jnp.transpose(x4, (0, 2, 1, 3)).reshape(B * F, C, 1, N)
        out = _forward(xt, params, force_two_pass=force_two_pass,
                       spatial_block_bytes=spatial_block_bytes)
        return jnp.transpose(out.reshape(B, F, C, N), (0, 2, 1, 3))

    block_bytes = spatial_block_bytes or max(1 << 20, min(8 << 20, cap // 16))
    tn = _pick_spatial_tile(N, C, isz, cap, block_bytes, need_divisor=(F > 1))
    tpf = pl.cdiv(N, tn)                      # tiles per frame
    ragged = (N % tn) != 0                    # only possible when F == 1

    x3 = x4.reshape(B, C, F * N)              # free: merges trailing dims
    kw_row = kw.reshape(1, C).astype(x4.dtype)

    # Pass 1: attention pooling (online softmax over n) + fused gate MLP.
    # TODO(synk): for B*F == 1 on v7x the only parallel extent is 1; splitting
    # the reduction across the two TensorCores would recover the idle core.
    pool_gate = functools.partial(_pool_gate_kernel, tn=tn, n_valid=N,
                                  ragged=ragged)
    gates = pl.pallas_call(
        pool_gate,
        out_shape=jax.ShapeDtypeStruct((B, F, C, 1), jnp.float32),
        grid_spec=pltpu.PrefetchScalarGridSpec(
            num_scalar_prefetch=0,
            grid=(B, F, tpf),
            in_specs=[
                pl.BlockSpec((1, C, tn), lambda b, f, n: (b, 0, f * tpf + n)),
                pl.BlockSpec((1, C),   lambda b, f, n: (0, 0)),
                pl.BlockSpec((Hd, C),  lambda b, f, n: (0, 0)),
                pl.BlockSpec((Hd, 1),  lambda b, f, n: (0, 0)),
                pl.BlockSpec((C, Hd),  lambda b, f, n: (0, 0)),
                pl.BlockSpec((C, 1),   lambda b, f, n: (0, 0)),
            ],
            out_specs=pl.BlockSpec((1, 1, C, 1), lambda b, f, n: (b, f, 0, 0)),
            scratch_shapes=[
                pltpu.VMEM((1, 1), jnp.float32),    # running max m
                pltpu.VMEM((1, 1), jnp.float32),    # running denom l
                pltpu.VMEM((C, 1), jnp.float32),    # unnormalized pooled
            ]),
        compiler_params=pltpu.CompilerParams(
            dimension_semantics=("parallel", "parallel", "arbitrary"),
            vmem_limit_bytes=vmem_limit),
    )(x3, kw_row, w1, b1, w2, b2)

    # Pass 2: lane-dense elementwise gating.
    out = pl.pallas_call(
        _apply_gates_kernel,
        out_shape=jax.ShapeDtypeStruct((B, C, F * N), x4.dtype),
        grid_spec=pltpu.PrefetchScalarGridSpec(
            num_scalar_prefetch=0,
            grid=(B, F, tpf),
            in_specs=[
                pl.BlockSpec((1, C, tn), lambda b, f, n: (b, 0, f * tpf + n)),
                pl.BlockSpec((1, 1, C, 1), lambda b, f, n: (b, f, 0, 0)),
            ],
            out_specs=pl.BlockSpec((1, C, tn),
                                   lambda b, f, n: (b, 0, f * tpf + n))),
        compiler_params=pltpu.CompilerParams(
            dimension_semantics=("parallel", "parallel", "parallel"),
            vmem_limit_bytes=vmem_limit),
    )(x3, gates)
    return out.reshape(B, C, F, N)


def squeeze_excite(x, params, *, force_two_pass=False, spatial_block_bytes=None):
    """SqueezeExcite forward. x: (B,C,H,W) or video (B,C,F,H,W), f32 or bf16."""
    if x.ndim == 5:
        B, C, F, H, W = x.shape
        out = _forward(x.reshape(B, C, F, H * W), params,
                       force_two_pass=force_two_pass,
                       spatial_block_bytes=spatial_block_bytes)
        return out.reshape(B, C, F, H, W)
    B, C, H, W = x.shape
    out = _forward(x.reshape(B, C, 1, H * W), params,
                   force_two_pass=force_two_pass,
                   spatial_block_bytes=spatial_block_bytes)
    return out.reshape(B, C, H, W)


def init_params(key, dim, dim_out=None, dim_hidden_min=16, init_bias=-10.0):
    """Parameter shapes mirroring SqueezeExcite.__init__."""
    dim_out = dim if dim_out is None else dim_out
    dim_hidden = max(dim_hidden_min, dim_out // 2)
    k0, k1, k2, k3 = jax.random.split(key, 4)
    kw = jax.random.normal(k0, (dim, 1), jnp.float32) * 0.1        # to_k weight
    kb = jax.random.normal(k1, (1, 1), jnp.float32) * 0.1          # to_k bias
    w1 = jax.random.normal(k2, (dim_hidden, dim), jnp.float32) * 0.1
    b1 = jax.random.normal(k3, (dim_hidden, 1), jnp.float32) * 0.1
    w2 = jnp.zeros((dim_out, dim_hidden), jnp.float32)             # zero init
    b2 = jnp.full((dim_out, 1), init_bias, jnp.float32)            # const -10
    return (kw, kb, w1, b1, w2, b2)


def ref_forward(x, params):
    """Pure-JAX reference matching the PyTorch forward (keeps the to_k bias)."""
    kw, kb, w1, b1, w2, b2 = params
    hp = jax.lax.Precision.HIGHEST
    if x.ndim == 5:
        B, C, F, H, W = x.shape
    else:
        B, C, H, W = x.shape
        F = 1
    xf = x.reshape(B, C, F, H * W).astype(jnp.float32)
    logits = jnp.einsum('bcfn,co->bfn', xf, kw, precision=hp) + kb[0, 0]
    attn = jax.nn.softmax(logits, axis=-1)
    pooled = jnp.einsum('bcfn,bfn->bfc', xf, attn, precision=hp)
    h = jnp.einsum('bfc,jc->bfj', pooled, w1, precision=hp) + b1[:, 0]
    h = jnp.where(h >= 0, h, 0.1 * h)
    g = jnp.einsum('bfj,cj->bfc', h, w2, precision=hp) + b2[:, 0]
    gates = jnp.transpose(jax.nn.sigmoid(g), (0, 2, 1))            # (B, C, F)
    out = xf * gates[:, :, :, None]
    return out.reshape(x.shape)


if __name__ == "__main__":
    key = jax.random.PRNGKey(0)
    keys = jax.random.split(key, 8)

    # ---- 4-D image path ----
    B, C, H, W = 2, 4, 16, 16
    x = jax.random.normal(keys[0], (B, C, H, W), jnp.float32)
    kw_, kb_, w1_, b1_, w2_, b2_ = init_params(keys[1], dim=C)
    # The module zero-inits the last conv (gates would be constant
    # sigmoid(-10)); randomize it so the attention-pool path is exercised.
    w2_ = jax.random.normal(keys[2], w2_.shape, jnp.float32) * 0.2
    params = (kw_, kb_, w1_, b1_, w2_, b2_)

    ref32 = ref_forward(x, params)
    xb = x.astype(jnp.bfloat16)
    refbf = ref_forward(xb.astype(jnp.float32), params)

    for force, blk in ((False, None), (True, 2048)):
        out32 = jax.block_until_ready(
            squeeze_excite(x, params, force_two_pass=force,
                           spatial_block_bytes=blk))
        assert out32.shape == (B, C, H, W) and out32.dtype == jnp.float32
        assert jnp.allclose(out32, ref32, atol=1e-4, rtol=1e-4), \
            f"f32 mismatch (force_two_pass={force})"

        outbf = jax.block_until_ready(
            squeeze_excite(xb, params, force_two_pass=force,
                           spatial_block_bytes=blk))
        assert outbf.dtype == jnp.bfloat16
        assert jnp.allclose(outbf.astype(jnp.float32), refbf,
                            atol=3e-2, rtol=3e-2), \
            f"bf16 mismatch (force_two_pass={force})"

    # ---- ragged spatial (N % 128 != 0) through the masked two-pass path ----
    Br, Cr, Hr, Wr = 2, 8, 12, 12
    xr = jax.random.normal(keys[3], (Br, Cr, Hr, Wr), jnp.float32)
    kwr, kbr, w1r, b1r, w2r, b2r = init_params(keys[4], dim=Cr)
    w2r = jax.random.normal(keys[5], w2r.shape, jnp.float32) * 0.2
    pr = (kwr, kbr, w1r, b1r, w2r, b2r)
    outr = jax.block_until_ready(
        squeeze_excite(xr, pr, force_two_pass=True, spatial_block_bytes=4096))
    assert jnp.allclose(outr, ref_forward(xr, pr), atol=1e-4, rtol=1e-4), \
        "ragged two-pass mismatch"

    # ---- 5-D video path: fused (C, F, N) kernel, no transposes ----
    Bv, Cv, Fv, Hv, Wv = 2, 4, 3, 8, 8
    xv = jax.random.normal(keys[6], (Bv, Cv, Fv, Hv, Wv), jnp.float32)
    kwv, kbv, w1v, b1v, w2v, b2v = init_params(keys[7], dim=Cv)
    w2v = jax.random.normal(keys[2], w2v.shape, jnp.float32) * 0.2
    pv = (kwv, kbv, w1v, b1v, w2v, b2v)
    outv = jax.block_until_ready(squeeze_excite(xv, pv))
    assert jnp.allclose(outv, ref_forward(xv, pv), atol=1e-4, rtol=1e-4), \
        "5-D fused path mismatch"

    # ---- 5-D video path through the two-pass lane-window kernels ----
    Bw, Cw, Fw, Hw, Ww = 1, 4, 2, 16, 16
    xw = jax.random.normal(keys[0], (Bw, Cw, Fw, Hw, Ww), jnp.float32)
    outw = jax.block_until_ready(
        squeeze_excite(xw, pv, force_two_pass=True, spatial_block_bytes=2048))
    assert jnp.allclose(outw, ref_forward(xw, pv), atol=1e-4, rtol=1e-4), \
        "5-D two-pass path mismatch"

    print("KERNEL_OK")
</pallas_src>

<mosaic_0001>
module attributes {stable_mosaic.version = 11 : i64} {
  func.func @_fused_kernel_2d(%arg0: i32, %arg1: memref<1x4x256xf32, #tpu.memory_space<vmem>>, %arg2: memref<1x4xf32, #tpu.memory_space<vmem>>, %arg3: memref<16x4xf32, #tpu.memory_space<vmem>>, %arg4: memref<16x1xf32, #tpu.memory_space<vmem>>, %arg5: memref<4x16xf32, #tpu.memory_space<vmem>>, %arg6: memref<4x1xf32, #tpu.memory_space<vmem>>, %arg7: memref<1x4x256xf32, #tpu.memory_space<vmem>>) attributes {dimension_semantics = [#tpu.dimension_semantics<parallel>], iteration_bounds = array<i64: 2>, scalar_prefetch = 0 : i64, scratch_operands = 0 : i64, tpu.core_type = #tpu.core_type<tc>, window_params = [{transform_indices = @transform_0, window_bounds = array<i64: 1, 4, 256>}, {pipeline_mode = #tpu.pipeline_mode<synchronous>, transform_indices = @transform_1, window_bounds = array<i64: 1, 4>}, {pipeline_mode = #tpu.pipeline_mode<synchronous>, transform_indices = @transform_2, window_bounds = array<i64: 16, 4>}, {pipeline_mode = #tpu.pipeline_mode<synchronous>, transform_indices = @transform_3, window_bounds = array<i64: 16, 1>}, {pipeline_mode = #tpu.pipeline_mode<synchronous>, transform_indices = @transform_4, window_bounds = array<i64: 4, 16>}, {pipeline_mode = #tpu.pipeline_mode<synchronous>, transform_indices = @transform_5, window_bounds = array<i64: 4, 1>}, {transform_indices = @transform_6, window_bounds = array<i64: 1, 4, 256>}]} {
    %c0 = arith.constant 0 : index
    %c0_0 = arith.constant 0 : index
    %c0_1 = arith.constant 0 : index
    %0 = vector.load %arg1[%c0, %c0_0, %c0_1] : memref<1x4x256xf32, #tpu.memory_space<vmem>>, vector<1x4x256xf32>
    %1 = vector.shape_cast %0 : vector<1x4x256xf32> to vector<4x256xf32>
    %c0_2 = arith.constant 0 : index
    %c0_3 = arith.constant 0 : index
    %2 = vector.load %arg2[%c0_2, %c0_3] : memref<1x4xf32, #tpu.memory_space<vmem>>, vector<1x4xf32>
    %cst = arith.constant dense<0.000000e+00> : vector<1x256xf32>
    %3 = tpu.matmul %2, %1, %cst {dimension_numbers = #tpu.dot_dimension_numbers<[1], [0], [0], [1], [0, 0, 1, 1], [], []>, precision = #tpu.contract_precision<fp32>} : vector<1x4xf32>, vector<4x256xf32>, vector<1x256xf32> -> vector<1x256xf32>
    %cst_4 = arith.constant dense<0xFF800000> : vector<1xf32>
    %4 = vector.multi_reduction <maximumf>, %3, %cst_4 [1] : vector<1x256xf32> to vector<1xf32>
    %5 = vector.shape_cast %4 : vector<1xf32> to vector<1x1xf32>
    %6 = vector.broadcast %5 : vector<1x1xf32> to vector<1x256xf32>
    %7 = arith.subf %3, %6 : vector<1x256xf32>
    %8 = math.exp %7 : vector<1x256xf32>
    %cst_5 = arith.constant dense<0.000000e+00> : vector<1xf32>
    %9 = vector.multi_reduction <add>, %8, %cst_5 [1] : vector<1x256xf32> to vector<1xf32>
    %10 = vector.shape_cast %9 : vector<1xf32> to vector<1x1xf32>
    %11 = tpu.reciprocal %10 : vector<1x1xf32> -> vector<1x1xf32>
    %12 = vector.broadcast %11 : vector<1x1xf32> to vector<1x256xf32>
    %13 = arith.mulf %8, %12 : vector<1x256xf32>
    %cst_6 = arith.constant dense<0.000000e+00> : vector<4x1xf32>
    %14 = tpu.matmul %1, %13, %cst_6 {dimension_numbers = #tpu.dot_dimension_numbers<[1], [1], [0], [0], [0, 0, 1, 0], [], []>, precision = #tpu.contract_precision<fp32>} : vector<4x256xf32>, vector<1x256xf32>, vector<4x1xf32> -> vector<4x1xf32>
    %c0_7 = arith.constant 0 : index
    %c0_8 = arith.constant 0 : index
    %15 = vector.load %arg3[%c0_7, %c0_8] : memref<16x4xf32, #tpu.memory_space<vmem>>, vector<16x4xf32>
    %cst_9 = arith.constant dense<0.000000e+00> : vector<16x1xf32>
    %16 = tpu.matmul %15, %14, %cst_9 {dimension_numbers = #tpu.dot_dimension_numbers<[1], [0], [0], [1], [0, 0, 1, 1], [], []>, precision = #tpu.contract_precision<fp32>} : vector<16x4xf32>, vector<4x1xf32>, vector<16x1xf32> -> vector<16x1xf32>
    %c0_10 = arith.constant 0 : index
    %c0_11 = arith.constant 0 : index
    %17 = vector.load %arg4[%c0_10, %c0_11] : memref<16x1xf32, #tpu.memory_space<vmem>>, vector<16x1xf32>
    %18 = arith.addf %16, %17 : vector<16x1xf32>
    %cst_12 = arith.constant 0.000000e+00 : f32
    %19 = vector.broadcast %cst_12 : f32 to vector<16x1xf32>
    %20 = arith.cmpf oge, %18, %19 : vector<16x1xf32>
    %cst_13 = arith.constant 1.000000e-01 : f32
    %21 = vector.broadcast %cst_13 : f32 to vector<16x1xf32>
    %22 = arith.mulf %21, %18 : vector<16x1xf32>
    %23 = arith.select %20, %18, %22 : vector<16x1xi1>, vector<16x1xf32>
    %c0_14 = arith.constant 0 : index
    %c0_15 = arith.constant 0 : index
    %24 = vector.load %arg5[%c0_14, %c0_15] : memref<4x16xf32, #tpu.memory_space<vmem>>, vector<4x16xf32>
    %cst_16 = arith.constant dense<0.000000e+00> : vector<4x1xf32>
    %25 = tpu.matmul %24, %23, %cst_16 {dimension_numbers = #tpu.dot_dimension_numbers<[1], [0], [0], [1], [0, 0, 1, 1], [], []>, precision = #tpu.contract_precision<fp32>} : vector<4x16xf32>, vector<16x1xf32>, vector<4x1xf32> -> vector<4x1xf32>
    %c0_17 = arith.constant 0 : index
    %c0_18 = arith.constant 0 : index
    %26 = vector.load %arg6[%c0_17, %c0_18] : memref<4x1xf32, #tpu.memory_space<vmem>>, vector<4x1xf32>
    %27 = arith.addf %25, %26 : vector<4x1xf32>
    %28 = arith.negf %27 : vector<4x1xf32>
    %29 = math.exp %28 : vector<4x1xf32>
    %cst_19 = arith.constant 1.000000e+00 : f32
    %30 = vector.broadcast %cst_19 : f32 to vector<4x1xf32>
    %31 = arith.addf %30, %29 : vector<4x1xf32>
    %32 = arith.divf %30, %31 : vector<4x1xf32>
    %33 = vector.broadcast %32 : vector<4x1xf32> to vector<4x256xf32>
    %34 = arith.mulf %1, %33 : vector<4x256xf32>
    %c0_20 = arith.constant 0 : index
    %c0_21 = arith.constant 0 : index
    %c0_22 = arith.constant 0 : index
    %35 = vector.load %arg7[%c0_20, %c0_21, %c0_22] : memref<1x4x256xf32, #tpu.memory_space<vmem>>, vector<1x4x256xf32>
    %36 = vector.shape_cast %35 : vector<1x4x256xf32> to vector<4x256xf32>
    %37 = vector.shape_cast %34 : vector<4x256xf32> to vector<1x4x256xf32>
    tpu.vector_store %arg7[%c0_20, %c0_21, %c0_22], %37 {strides = array<i32>} : memref<1x4x256xf32, #tpu.memory_space<vmem>>, vector<1x4x256xf32>,
    return
  }
  func.func @transform_0(%arg0: i32) -> (i32, i32, i32) {
    %c0_i32 = arith.constant 0 : i32
    %c0_i32_0 = arith.constant 0 : i32
    %c0_i32_1 = arith.constant 0 : i32
    return %arg0, %c0_i32, %c0_i32_0 : i32, i32, i32
  }
  func.func @transform_1(%arg0: i32) -> (i32, i32) {
    %c0_i32 = arith.constant 0 : i32
    %c0_i32_0 = arith.constant 0 : i32
    %c0_i32_1 = arith.constant 0 : i32
    return %c0_i32, %c0_i32_0 : i32, i32
  }
  func.func @transform_2(%arg0: i32) -> (i32, i32) {
    %c0_i32 = arith.constant 0 : i32
    %c0_i32_0 = arith.constant 0 : i32
    %c0_i32_1 = arith.constant 0 : i32
    return %c0_i32, %c0_i32_0 : i32, i32
  }
  func.func @transform_3(%arg0: i32) -> (i32, i32) {
    %c0_i32 = arith.constant 0 : i32
    %c0_i32_0 = arith.constant 0 : i32
    %c0_i32_1 = arith.constant 0 : i32
    return %c0_i32, %c0_i32_0 : i32, i32
  }
  func.func @transform_4(%arg0: i32) -> (i32, i32) {
    %c0_i32 = arith.constant 0 : i32
    %c0_i32_0 = arith.constant 0 : i32
    %c0_i32_1 = arith.constant 0 : i32
    return %c0_i32, %c0_i32_0 : i32, i32
  }
  func.func @transform_5(%arg0: i32) -> (i32, i32) {
    %c0_i32 = arith.constant 0 : i32
    %c0_i32_0 = arith.constant 0 : i32
    %c0_i32_1 = arith.constant 0 : i32
    return %c0_i32, %c0_i32_0 : i32, i32
  }
  func.func @transform_6(%arg0: i32) -> (i32, i32, i32) {
    %c0_i32 = arith.constant 0 : i32
    %c0_i32_0 = arith.constant 0 : i32
    %c0_i32_1 = arith.constant 0 : i32
    return %arg0, %c0_i32, %c0_i32_0 : i32, i32, i32
  }
}

</mosaic_0001>

<bundles_post_ra>
// kernel: tpu_custom_call.1
= control target key start
LH: loop header
LB: loop body
LE: loop exit
PB: predicated region body
PF: predicated region fallthrough
CT: control target
= control target key end

     0   :  { %11 = vsyncpa [#allocation3], 0  ;;  %s1369_s0 = inlined_call_operand.vmem [shape: f32[2,4,256], index: 0, kind: input, shape index: {}]   ;;  %s1370_s1 = inlined_call_operand.vmem [shape: f32[1,4], index: 1, kind: input, shape index: {}]   ;;  %s1371_s2 = inlined_call_operand.vmem [shape: f32[16,4], index: 2, kind: input, shape index: {}]   ;;  %s1372_s3 = inlined_call_operand.vmem [shape: f32[16,1], index: 3, kind: input, shape index: {}]   ;;  %s1373_s4 = inlined_call_operand.vmem [shape: f32[4,16], index: 4, kind: input, shape index: {}]   ;;  %s1374_s5 = inlined_call_operand.vmem [shape: f32[4,1], index: 5, kind: input, shape index: {}]   ;;  %s1375_s6 = inlined_call_operand.hbm [shape: f32[2,4,256], index: 6, kind: output, shape index: {}]  }
   0x1   :  { %13 = vsyncpa [#allocation3 + $0x1], 0  ;;  %s1245_s21 = smov 0   ;;  %s1247_s22 = smov 0  }
   0x2   :  { %s1249_s23 = smov 0   ;;  %s1251_s24 = smov 0  }
   0x3 LB: > { %s1266_s25 = sadd.s32 4294967295, %s1206_s24   ;;  %s1076_s26 = sadd.s32 4294967294, %s1206_s24   ;;  %s1206_s24 = sphi %s1251_s24, %s1381_s24   ;;  %s1202_s23 = sphi %s1249_s23, %s1380_s23   ;;  %s1198_s22 = sphi %s1247_s22, %s1379_s22   ;;  %s1194_s21 = sphi %s1245_s21, %s1378_s21  }
   0x4   : > { %s1270_s27 = sadd.s32 1, %s1206_s24   ;;  %s157_s28 = sadd.s32 1, %s1202_s23 }
   0x5   : > { %s154_s29 = ssub.s32 %s1206_s24, %s1270_s27  ;;  %p167_p0 = scmp.ne.s32.totalorder %s1202_s23, %s1198_s22 }
   0x6   : > { %p155_p1 = scmp.eq.s32.totalorder %s154_s29, 0  ;;  %p168_p2 = scmp.eq.s32.totalorder %s1266_s25, 1 }
   0x7   : > { %p173_p3 = scmp.ne.s32.totalorder %s1198_s22, %s1194_s21  ;;  %p174_p4 = scmp.eq.s32.totalorder %s1076_s26, 1 }
   0x8   : > { %s1281_s30 = scalar_select %p155_p1, %s1202_s23, %s157_s28  }
   0x9   : > { %p1283_p5 = por %p168_p2, %p167_p0  ;;  %p1287_p6 = por %p174_p4, %p173_p3 }
   0xa   : > { %p1079_p7 = scmp.ge.s32.totalorder %s1206_s24, 1  ;;  %p215_p8 = scmp.lt.s32.totalorder %s1206_s24, 3 }
   0xc   : > { %p216_p9 = pnand %p1079_p7, %p215_p8 }
   0xd   : > { %p245_p10 = scmp.lt.s32.totalorder (!%p216_p9), %s1266_s25, 1  ;;  %s242_s13 = sand.u32 (!%p216_p9), 1, %s1198_s22  }
   0xe   : > { %219 = sbr.rel (%p216_p9) target bundleno = 1071 (0x42f), region = 44  ;;  %s1080_s14 = sshll.u32 (!%p216_p9), %s242_s13, 3 }
   0xf   : > { %s244_s19 = scalar_lea.vmem (!%p216_p9), [#allocation2], %s1080_s14  ;;  %s1001_s28 = scalar_lea.sflag (!%p216_p9), [#allocation3], %s242_s13 }
  0x10   : > { %s1014_s20 = sshll.u32 (!%p216_p9), %s244_s19, 4  ;;  %s1015_s20 = int_to_ptr.vmem [resolvable:$true] %s1014_s20 }
  0x13   : > { %v251_v0 = vld [vmem:[%s1370_s1] sm:$0x1]  ;;  %vm256_vm0 = vcmask 31744   ;;  %s246_s11 = scalar_select %p245_p10, %s1266_s25, 1  ;;  %vm260_vm1 = vcmask 1043456   ;;  %vm557_vm2 = vcmask 1040384  }
  0x14   : > { %v258_v1 = vsel %vm256_vm0, %v251_v0, 0  ;;  %vm807_vm7 = vcmask 130048  }
  0x15   : > { %v282_v2 = vand.u32 4294901760, %v258_v1  ;;  %s1089_s12 = sshll.u32 %s246_s11, 3  ;;  %s1164_s11 = scalar_lea.hbm %s1375_s6, 16 }
  0x16   : > { %s249_s15 = scalar_lea.vmem %s1369_s0, %s1089_s12 }
  0x17   : > { %v283_v3 = vsub.f32 %v258_v1, %v282_v2  ;;  %v1302_v4 = vld [vmem:[%s249_s15] sm:$0xff]  ;;  %s1090_s15 = sshll.u32 %s1266_s25, 3 }
  0x18   : > { %253 = vst [vmem:[#allocation1] ss:$2 sm:$0xff] %v1302_v4  ;;  %s1012_s18 = scalar_lea.hbm %s1375_s6, %s1090_s15 }
  0x19   : > { %v284_v5 = vand.u32 4294901760, %v283_v3  ;;  %s1016_s26 = sshll.u32 %s1012_s18, 4  ;;  %s1017_s26 = int_to_ptr.hbm [resolvable:$true] %s1016_s26 }
  0x1a   : > { %s1158_s29 = sshra.s32 %s1017_s26, 4  ;;  %s1159_s29 = int_to_ptr.hbm [resolvable:$true] %s1158_s29 }
  0x1b   : > { %v285_v6 = vsub.f32 %v283_v3, %v284_v5  ;;  %s1160_s25 = scalar_lea.hbm %s1159_s29, 8  ;;  %p1165_p0 = scmp.lt.s32.totalorder %s1159_s29, %s1375_s6 }
  0x1c   : > { %p1161_p11 = scmp.ne.s32.totalorder %s1159_s29, %s1160_s25  ;;  %p1166_p1 = scmp.lt.s32.totalorder %s1164_s11, %s1160_s25 }
  0x1d   : > { %v286_v10 = vand.u32 4294901760, %v285_v6 }
  0x1e   : > { %p1162_p12 = pnand %p1161_p11, %p1283_p5  ;;  %p1167_p2 = por %p1166_p1, %p1165_p0 }
  0x1f   : > { %v254_v7 = vld.sshfl [vmem:[#allocation1] sm:$0xff pattern:$0x75316420]  ;;  %v255_v8 = vld.sshfl [vmem:[#allocation1 + $0x8] sm:$0xff pattern:$0x75316420] }
  0x20   : > { %v261_v9 = vsel %vm260_vm1, %v254_v7, 0  ;;  %v263_v11 = vsel %vm260_vm1, %v255_v8, 0  ;;  %p1163_p13 = pneg %p1162_p12 }
  0x21   : > { %v280_v12 = vand.u32 4294901760, %v261_v9  ;;  %v426_v13 = vand.u32 4294901760, %v263_v11 }
  0x22   : > { %p1168_p3 = pnand %p1167_p2, %p1163_p13 }
  0x23   : > { %281 = vmatpush.msra.mxu0 %v280_v12  ;;  %v307_v14 = vsub.f32 %v261_v9, %v280_v12  ;;  %357 = vmatpush.msra.mxu3 %v280_v12  ;;  %v453_v15 = vsub.f32 %v263_v11, %v426_v13 }
  0x24   : > { %287 = vmatmul.f32.vlgmr.msra.gmra.mxu0 %v286_v10  ;;  %361 = vmatmul.f32.vlgmr.msra.gmra.mxu3 %v284_v5 }
  0x25   : > { %334 = vmatpush.msra.mxu2 %v307_v14  ;;  %v308_v16 = vand.u32 4294901760, %v307_v14  ;;  %v454_v17 = vand.u32 4294901760, %v453_v15 }
  0x26   : > { %337 = vmatmul.f32.vlgmr.msra.gmra.mxu2 %v283_v3 }
  0x27   : > { %v309_v18 = vsub.f32 %v307_v14, %v308_v16  ;;  %383 = vmatpush.msrb.mxu0 %v308_v16  ;;  %427 = vmatpush.msrb.mxu2 %v426_v13  ;;  %v455_v19 = vsub.f32 %v453_v15, %v454_v17 }
  0x29   : > { %480 = vmatpush.msra.mxu0 %v453_v15  ;;  %529 = vmatpush.msra.mxu2 %v454_v17  ;;  %v310_v20 = vand.u32 4294901760, %v309_v18  ;;  %v456_v21 = vand.u32 4294901760, %v455_v19  ;;  %v609_v17 = vld [vmem:[%s1371_s2] sm:$0xff] }
  0x2a   : > { %v614_v18 = vsel %vm256_vm0, %v609_v17, 0 }
  0x2b   : > { %311 = vmatpush.msra.mxu1 %v310_v20  ;;  %457 = vmatpush.msrb.mxu3 %v456_v21  ;;  %v639_v19 = vand.u32 4294901760, %v614_v18  ;;  %v610_v20 = vld [vmem:[%s1371_s2 + $0x8] sm:$0xff] }
  0x2c   : > { %313 = vmatmul.f32.vlgmr.msra.gmra.mxu1 %v282_v2  ;;  %385 = vmatmul.f32.vlgmr.msrb.gmra.mxu0 %v282_v2 }
  0x2d   : > { %459 = vmatmul.f32.vlgmr.msrb.gmra.mxu3 %v282_v2  ;;  %405 = vmatpush.msrb.mxu1 %v280_v12  ;;  %v640_v21 = vsub.f32 %v614_v18, %v639_v19 }
  0x2e   : > { %433 = vmatmul.f32.vlgmr.msrb.gmra.mxu2 %v286_v10  ;;  %551 = vmatpush.msra.mxu3 %v426_v13 }
  0x2f   : > { %503 = vmatpush.msra.mxu1 %v426_v13 }
  0x34   : > { %407 = vmatmul.f32.vlgmr.msrb.gmra.mxu1 %v282_v2  ;;  %483 = vmatmul.f32.vlgmr.msra.gmra.mxu0 %v283_v3 }
  0x35   : > { %553 = vmatmul.f32.vlgmr.msra.gmra.mxu3 %v282_v2 }
  0x36   : > { %531 = vmatmul.f32.vlgmr.msra.gmra.mxu2 %v282_v2 }
  0x3c   : > { %507 = vmatmul.f32.vlgmr.msra.gmra.mxu1 %v284_v5 }
  0xa1   : > { %v288_v22 = vpop.f32.mrf.mxu0 }
  0xa7   : > { %v362_v23 = vpop.f32.mrf.mxu3 }
  0xa9   : > { %v314_v24 = vpop.f32.mrf.mxu1  ;;  %v338_v25 = vpop.f32.mrf.mxu2 }
  0xaa   : > { %v386_v26 = vpop.f32.mrf.mxu0  ;;  %v315_v27 = vadd.f32 %v314_v24, %v288_v22  ;;  %v617_v22 = vsel %vm256_vm0, %v610_v20, 0 }
  0xab   : > { %v647_v24 = vand.u32 4294901760, %v617_v22 }
  0xac   : > { %v339_v28 = vadd.f32 %v338_v25, %v315_v27 }
  0xae   : > { %v363_v32 = vadd.f32 %v362_v23, %v339_v28  ;;  %v641_v23 = vand.u32 4294901760, %v640_v21 }
  0xb0   : > { %v460_v29 = vpop.f32.mrf.mxu3  ;;  %v387_v35 = vadd.f32 %v386_v26, %v363_v32  ;;  %v642_v25 = vsub.f32 %v640_v21, %v641_v23  ;;  %v648_v26 = vsub.f32 %v617_v22, %v647_v24 }
  0xb1   : > { %v408_v30 = vpop.f32.mrf.mxu1  ;;  %v434_v31 = vpop.f32.mrf.mxu2 }
  0xb2   : > { %v461_v33 = vadd.f32 %v460_v29, %v434_v31  ;;  %v484_v34 = vpop.f32.mrf.mxu0  ;;  %v409_v41 = vadd.f32 %v408_v30, %v387_v35  ;;  %v643_v29 = vand.u32 4294901760, %v642_v25  ;;  %v649_v30 = vand.u32 4294901760, %v648_v26 }
  0xb4   : > { %v485_v36 = vadd.f32 %v484_v34, %v461_v33  ;;  %v558_v44 = vsel %vm557_vm2, %v409_v41, -inf  ;;  %v650_v33 = vsub.f32 %v648_v26, %v649_v30 }
  0xb8   : > { %v554_v40 = vpop.f32.mrf.mxu3 }
  0xb9   : > { %v508_v37 = vpop.f32.mrf.mxu1  ;;  %v532_v38 = vpop.f32.mrf.mxu2 }
  0xba   : > { %v509_v39 = vadd.f32 %v508_v37, %v485_v36  ;;  %v651_v36 = vand.u32 4294901760, %v650_v33 }
  0xbc   : > { %v533_v42 = vadd.f32 %v532_v38, %v509_v39  ;;  %v611_v39 = vld [vmem:[%s1372_s3] sm:$0xff] }
  0xbe   : > { %v555_v43 = vadd.f32 %v554_v40, %v533_v42 }
  0xc0   : > { %v559_v45 = vsel %vm557_vm2, %v555_v43, -inf }
  0xc1   : > { %v560_v46 = vmax.f32 %v558_v44, %v559_v45  ;;  %v612_v45 = vld [vmem:[%s1372_s3 + $0x8] sm:$0xff] }
  0xc3   : > { %561 = vmax.xlane.f32.xlu0 %v560_v46 }
 0x136   : > { %v562_v47 = vpop.xlane.xlu0 %561 }
 0x137   : > { %v563_v48 = vsub.f32 %v409_v41, %v562_v47  ;;  %v564_v49 = vsub.f32 %v555_v43, %v562_v47 }
 0x139   : > { %v565_v50 = vmul.f32 1.442695, %v563_v48  ;;  %v567_v51 = vmul.f32 1.442695, %v564_v49 }
 0x13b   : > { %1134 = vpow2.f32 %v565_v50 }
 0x13c   : > { %1136 = vpow2.f32 %v567_v51  ;;  %v805_v51 = vld [vmem:[%s1373_s4] sm:$0xf] }
 0x141   : > { %v1135_v52 = vpop.eup %1134 }
 0x142   : > { %v1137_v53 = vpop.eup %1136  ;;  %v569_v54 = vsel %vm557_vm2, %v1135_v52, 0.0 }
 0x143   : > { %v570_v55 = vsel %vm557_vm2, %v1137_v53, 0.0 }
 0x144   : > { %v571_v56 = vadd.f32 %v570_v55, %v569_v54  ;;  %v809_v54 = vsel %vm807_vm7, %v805_v51, 0 }
 0x146   : > { %572 = vadd.xlane.f32.xlu0 %v571_v56 }
 0x1b9   : > { %v573_v57 = vpop.xlane.xlu0 %572 }
 0x1ba   : > { %1138 = vrcp.f32 %v573_v57  ;;  %v585_v61 = vand.u32 2147483648, %v573_v57  ;;  %v583_v63 = vand.u32 2147483647, %v573_v57  ;;  %vm579_vm4 = vweird.f32 %v573_v57 }
 0x1bc   : > { %v586_v1 = vor.u32 1.1754944e-38, %v585_v61  ;;  %vm584_vm6 = vcmp.eq.f32.partialorder %v583_v63, 8.507059e+37 }
 0x1c0   : > { %v1139_v58 = vpop.eup %1138 }
 0x1c1   : > { %v575_v59 = vmul.f32 %v1139_v58, %v573_v57  ;;  %vm580_vm3 = vweird.f32 %v1139_v58 }
 0x1c2   : > { %vm581_vm5 = vmor %vm579_vm4, %vm580_vm3 }
 0x1c3   : > { %v576_v60 = vsub.f32 1.0, %v575_v59 }
 0x1c5   : > { %v577_v62 = vmul.f32 %v1139_v58, %v576_v60 }
 0x1c7   : > { %v578_v0 = vadd.f32 %v1139_v58, %v577_v62 }
 0x1c9   : > { %v582_v2 = vsel %vm581_vm5, %v1139_v58, %v578_v0  ;;  %v829_v58 = vand.u32 4294901760, %v809_v54 }
 0x1ca   : > { %v587_v3 = vsel %vm584_vm6, %v586_v1, %v582_v2 }
 0x1cb   : > { %v588_v5 = vmul.f32 %v1135_v52, %v587_v3  ;;  %v589_v6 = vmul.f32 %v1137_v53, %v587_v3  ;;  %v830_v0 = vsub.f32 %v809_v54, %v829_v58 }
 0x1cd   : > { %v591_v7 = vperm.slane %v589_v6, 0  ;;  %v590_v8 = vperm.slane %v588_v5, 0 }
 0x1cf   : > { %v594_v9 = vrot.slane %v591_v7, 4  ;;  %v831_v7 = vand.u32 4294901760, %v830_v0 }
 0x1d1   : > { %v595_v10 = vsel %vm260_vm1, %v590_v8, %v594_v9 }
 0x1d2   : > { %v597_v11 = vmul.f32 %v595_v10, %v1302_v4 }
 0x1d4   : > { %599 = vst [vmem:[#allocation1] ss:$2 sm:$0xff] %v597_v11  ;;  %v832_v11 = vsub.f32 %v830_v0, %v831_v7 }
 0x1db   : > { %v600_v12 = vld.sshfl [vmem:[#allocation1] sm:$0xff pattern:$0x75316420]  ;;  %v601_v13 = vld.sshfl [vmem:[#allocation1 + $0x8] sm:$0xff pattern:$0x75316420] }
 0x1dc   : > { %v604_v14 = vsel %vm260_vm1, %v600_v12, 0.0  ;;  %v605_v15 = vsel %vm260_vm1, %v601_v13, 0.0 }
 0x1dd   : > { %v606_v16 = vadd.f32 %v605_v15, %v604_v14 }
 0x1df   : > { %607 = vadd.xlane.f32.xlu1 %v606_v16  ;;  %v833_v16 = vand.u32 4294901760, %v832_v11 }
 0x252   : > { %v608_v27 = vpop.xlane.xlu1 %607 }
 0x253   : > { %v620_v28 = vsel %vm260_vm1, %v608_v27, 0 }
 0x254   : > { %v637_v31 = vand.u32 4294901760, %v620_v28 }
 0x256   : > { %v672_v32 = vsub.f32 %v620_v28, %v637_v31  ;;  %638 = vmatpush.msrb.mxu0 %v637_v31  ;;  %731 = vmatpush.msrb.mxu3 %v637_v31 }
 0x257   : > { %644 = vmatmul.f32.vlgmr.msrb.gmra.mxu0 %v643_v29  ;;  %735 = vmatmul.f32.vlgmr.msrb.gmra.mxu3 %v641_v23  ;;  %v1208_v23 = vmov 0  }
 0x258   : > { %v673_v34 = vand.u32 4294901760, %v672_v32  ;;  %703 = vmatpush.msrb.mxu2 %v672_v32  ;;  %1132 = vset.pattern.permute.xlu1 %v1208_v23 }
 0x259   : > { %706 = vmatmul.f32.vlgmr.msrb.gmra.mxu2 %v640_v21  ;;  %1133 = vset.pattern.permute.xlu0 %v1208_v23 }
 0x25a   : > { %v674_v35 = vsub.f32 %v672_v32, %v673_v34  ;;  %763 = vmatpush.msra.mxu0 %v673_v34 }
 0x25c   : > { %v675_v37 = vand.u32 4294901760, %v674_v35 }
 0x25e   : > { %676 = vmatpush.msrb.mxu1 %v675_v37 }
 0x25f   : > { %652 = vmatmul.f32.gmra.mxu0 %v651_v36  ;;  %678 = vmatmul.f32.vlgmr.msrb.gmra.mxu1 %v639_v19 }
 0x260   : > { %789 = vmatpush.msra.mxu1 %v637_v31  ;;  %741 = vmatmul.f32.gmra.mxu3 %v649_v30 }
 0x261   : > { %711 = vmatmul.f32.gmra.mxu2 %v648_v26 }
 0x267   : > { %682 = vmatmul.f32.gmra.mxu1 %v647_v24  ;;  %765 = vmatmul.f32.vlgmr.msra.gmra.mxu0 %v639_v19 }
 0x26f   : > { %769 = vmatmul.f32.gmra.mxu0 %v647_v24  ;;  %791 = vmatmul.f32.vlgmr.msra.gmra.mxu1 %v639_v19 }
 0x277   : > { %795 = vmatmul.f32.gmra.mxu1 %v647_v24  ;;  %v806_v24 = vld [vmem:[%s1374_s5] sm:$0xf] }
 0x2d4   : > { %v645_v38 = vpop.f32.mrf.mxu0 }
 0x2d5   : > { %v646_v42 = vadd.f32 %v645_v38, %v611_v39 }
 0x2da   : > { %v736_v46 = vpop.f32.mrf.mxu3 }
 0x2dc   : > { %v653_v40 = vpop.f32.mrf.mxu0  ;;  %v679_v41 = vpop.f32.mrf.mxu1 }
 0x2dd   : > { %v707_v43 = vpop.f32.mrf.mxu2  ;;  %v680_v44 = vadd.f32 %v679_v41, %v646_v42  ;;  %v654_v48 = vadd.f32 %v653_v40, %v612_v45 }
 0x2df   : > { %v708_v49 = vadd.f32 %v707_v43, %v680_v44 }
 0x2e1   : > { %v737_v52 = vadd.f32 %v736_v46, %v708_v49  ;;  %v1209_v49 = vmov 839922192  }
 0x2e3   : > { %v742_v61 = vpop.f32.mrf.mxu3 }
 0x2e4   : > { %v683_v47 = vpop.f32.mrf.mxu1  ;;  %v766_v50 = vpop.f32.mrf.mxu0 }
 0x2e5   : > { %v684_v53 = vadd.f32 %v683_v47, %v654_v48  ;;  %v712_v55 = vpop.f32.mrf.mxu2  ;;  %v767_v56 = vadd.f32 %v766_v50, %v737_v52  ;;  %v994_v50 = vunpack.c.l.s4 %v1209_v49 }
 0x2e7   : > { %v713_v59 = vadd.f32 %v712_v55, %v684_v53  ;;  %v995_v51 = vunpack.c.0.s8 %v994_v50 }
 0x2e9   : > { %v743_v1 = vadd.f32 %v742_v61, %v713_v59 }
 0x2ec   : > { %v792_v57 = vpop.f32.mrf.mxu1  ;;  %v770_v63 = vpop.f32.mrf.mxu0 }
 0x2ed   : > { %v793_v60 = vadd.f32 %v792_v57, %v767_v56  ;;  %v771_v3 = vadd.f32 %v770_v63, %v743_v1 }
 0x2ef   : > { %vm799_vm8 = vcmp.ge.f32.partialorder %v793_v60, 0.0  ;;  %v801_v62 = vmul.f32 0.1, %v793_v60 }
 0x2f1   : > { %v803_v2 = vsel %vm799_vm8, %v793_v60, %v801_v62 }
 0x2f2   : > { %v827_v5 = vand.u32 4294901760, %v803_v2 }
 0x2f4   : > { %v796_v6 = vpop.f32.mrf.mxu1  ;;  %v859_v10 = vsub.f32 %v803_v2, %v827_v5 }
 0x2f5   : > { %v797_v8 = vadd.f32 %v796_v6, %v771_v3 }
 0x2f6   : > { %v860_v15 = vand.u32 4294901760, %v859_v10 }
 0x2f7   : > { %vm800_vm9 = vcmp.ge.f32.partialorder %v797_v8, 0.0  ;;  %v802_v9 = vmul.f32 0.1, %v797_v8 }
 0x2f8   : > { %v861_v19 = vsub.f32 %v859_v10, %v860_v15 }
 0x2f9   : > { %v804_v12 = vsel %vm800_vm9, %v797_v8, %v802_v9 }
 0x2fa   : > { %v825_v13 = vand.u32 4294901760, %v804_v12  ;;  %v862_v21 = vand.u32 4294901760, %v861_v19 }
 0x2fc   : > { %v853_v14 = vsub.f32 %v804_v12, %v825_v13  ;;  %826 = vmatpush.msra.mxu2 %v825_v13  ;;  %962 = vmatpush.msrb.mxu1 %v825_v13 }
 0x2fe   : > { %828 = vmatpush.msra.mxu2 %v827_v5  ;;  %964 = vmatpush.msrb.mxu1 %v827_v5  ;;  %v854_v17 = vand.u32 4294901760, %v853_v14 }
 0x2ff   : > { %966 = vmatmul.f32.vlgmr.msrb.gmra.mxu1 %v829_v58  ;;  %834 = vmatmul.f32.vlgmr.msra.gmra.mxu2 %v833_v16 }
 0x300   : > { %885 = vmatpush.msrb.mxu2 %v853_v14  ;;  %937 = vmatpush.msrb.mxu0 %v854_v17  ;;  %v855_v18 = vsub.f32 %v853_v14, %v854_v17 }
 0x302   : > { %888 = vmatpush.msrb.mxu2 %v859_v10  ;;  %941 = vmatpush.msrb.mxu0 %v860_v15  ;;  %v856_v20 = vand.u32 4294901760, %v855_v18 }
 0x303   : > { %943 = vmatmul.f32.vlgmr.msrb.gmra.mxu0 %v829_v58 }
 0x304   : > { %857 = vmatpush.msra.mxu3 %v856_v20 }
 0x306   : > { %863 = vmatpush.msra.mxu3 %v862_v21 }
 0x307   : > { %865 = vmatmul.f32.vlgmr.msra.gmra.mxu3 %v829_v58  ;;  %891 = vmatmul.f32.vlgmr.msrb.gmra.mxu2 %v830_v0 }
 0x308   : > { %910 = vmatpush.msrb.mxu3 %v825_v13 }
 0x30a   : > { %912 = vmatpush.msrb.mxu3 %v827_v5 }
 0x30f   : > { %916 = vmatmul.f32.vlgmr.msrb.gmra.mxu3 %v831_v7 }
 0x37c   : > { %v967_v33 = vpop.f32.mrf.mxu1 }
 0x380   : > { %v944_v31 = vpop.f32.mrf.mxu0 }
 0x382   : > { %v835_v22 = vpop.f32.mrf.mxu2 }
 0x383   : > { %v836_v25 = vadd.f32 %v835_v22, %v806_v24 }
 0x38a   : > { %v866_v26 = vpop.f32.mrf.mxu3  ;;  %v892_v28 = vpop.f32.mrf.mxu2 }
 0x38b   : > { %v867_v27 = vadd.f32 %v866_v26, %v836_v25 }
 0x38d   : > { %v893_v29 = vadd.f32 %v892_v28, %v867_v27 }
 0x392   : > { %v917_v30 = vpop.f32.mrf.mxu3 }
 0x393   : > { %v918_v32 = vadd.f32 %v917_v30, %v893_v29 }
 0x395   : > { %v945_v34 = vadd.f32 %v944_v31, %v918_v32 }
 0x397   : > { %v968_v35 = vadd.f32 %v967_v33, %v945_v34 }
 0x399   : > { %v1083_v36 = vmul.f32 -1.442695, %v968_v35 }
 0x39b   : > { %1140 = vpow2.f32 %v1083_v36 }
 0x3a1   : > { %v1141_v37 = vpop.eup %1140 }
 0x3a2   : > { %v973_v38 = vadd.f32 1.0, %v1141_v37 }
 0x3a4   : > { %1142 = vrcp.f32 %v973_v38  ;;  %v985_v42 = vand.u32 2147483648, %v973_v38  ;;  %v983_v44 = vand.u32 2147483647, %v973_v38  ;;  %vm979_vm11 = vweird.f32 %v973_v38 }
 0x3a6   : > { %v986_v46 = vor.u32 1.1754944e-38, %v985_v42  ;;  %vm984_vm13 = vcmp.eq.f32.partialorder %v983_v44, 8.507059e+37 }
 0x3aa   : > { %v1143_v39 = vpop.eup %1142 }
 0x3ab   : > { %v975_v40 = vmul.f32 %v1143_v39, %v973_v38  ;;  %vm980_vm10 = vweird.f32 %v1143_v39 }
 0x3ac   : > { %vm981_vm12 = vmor %vm979_vm11, %vm980_vm10 }
 0x3ad   : > { %v976_v41 = vsub.f32 1.0, %v975_v40 }
 0x3af   : > { %v977_v43 = vmul.f32 %v1143_v39, %v976_v41 }
 0x3b1   : > { %v978_v45 = vadd.f32 %v1143_v39, %v977_v43 }
 0x3b3   : > { %v982_v47 = vsel %vm981_vm12, %v1143_v39, %v978_v45 }
 0x3b4   : > { %v987_v48 = vsel %vm984_vm13, %v986_v46, %v982_v47 }
 0x3b5   : > { %991 = vperm.xlu1 %1132, %v987_v48  }
 0x427   : > { %v992_v52 = vpop.permute.xlu1 %991 }
 0x428   : > { %v996_v53 = vperm.slane %v992_v52, %v995_v51 }
 0x42a   : > { %v998_v54 = vmul.f32 %v996_v53, %v1302_v4 }
 0x42c   : > { %999 = vst [vmem:[%s244_s19] sm:$0xff] %v998_v54 }
 0x42d   : > { %1171 = shalt.err (!%p1168_p3)
}
 0x42e   : > { %1091 = dma.vmem_to_hbm [thread:$0]  (%p1283_p5), %s1015_s20, 128, %s1017_s26, %s1001_s28  }
 0x42f PF: > { %p1097_p4 = scmp.ge.s32.totalorder %s1206_s24, 2  ;;  %s1028_s13 = sand.u32 1, %s1194_s21  }
 0x430   : > { %s1029_s15 = scalar_lea.sflag [#allocation3], %s1028_s13 }
 0x431   : > { %p1094_p7 = pnand %p1097_p4, %p1287_p6 }
 0x433   : > { %p1095_p8 = pneg %p1094_p7 }
 0x435   : > { %1189 = dma.done.wait (%p1095_p8), %s1029_s15, 128  }
 0x436   : > { %1191 = vsyncadd (%p1095_p8), %s1029_s15, 4294967168  ;;  %p16_p9 = scmp.ge.s32.totalorder %s1270_s27, 4   ;;  %s1378_s21 = smov %s1198_s22 }
 0x437   : > { %s1379_s22 = smov %s1202_s23  ;;  %s1380_s23 = smov %s1281_s30 }
 0x438   : > { %s1381_s24 = smov %s1270_s27  ;;  %18 = sbr.rel (!%p16_p9) target bundleno = 3 (0x3), region = 79 }
 0x43d   :  { %1035 = vsyncpa [#allocation3], 1 }
 0x43e   :  { %1037 = vsyncpa [#allocation3 + $0x1], 1 }

</bundles_post_ra>
